<compile_context>
chip_gen: v5e
topology: v5e:2x2
jax: 0.10.0
libtpu: 0.0.40
codegen_flags: <defaults>
</compile_context>

<pallas_src>
import functools

import jax
import jax.numpy as jnp
from jax.experimental import pallas as pl
from jax.experimental.pallas import tpu as pltpu

H1, H2, OUT = 128, 64, 2
H2_PAD = 128  # hidden-64 padded to 128 lanes (exact; see header comment)


def mlp_kernel(x_ref, w1_ref, b1_ref, w2_ref, b2_ref, w3_ref, b3_ref, o_ref):
    x = x_ref[...]
    cdt = x.dtype  # compute dtype (bf16 or f32); accumulation is always f32
    # Layer 1: (TB, F) @ (F, 128) + (1, 128) -> ReLU
    h1 = jnp.dot(x, w1_ref[...], preferred_element_type=jnp.float32)
    h1 = jnp.maximum(h1 + b1_ref[...], 0.0)
    # Layer 2: (TB, 128) @ (128, 128) + (1, 128) -> ReLU  (cols 64..127 are 0)
    h2 = jnp.dot(h1.astype(cdt), w2_ref[...], preferred_element_type=jnp.float32)
    h2 = jnp.maximum(h2 + b2_ref[...], 0.0)
    # Layer 3 (logits): (TB, 128) @ (128, 2) + (1, 2)
    o = jnp.dot(h2.astype(cdt), w3_ref[...], preferred_element_type=jnp.float32)
    o_ref[...] = (o + b3_ref[...]).astype(o_ref.dtype)


def _round_up(x, m):
    return -(-x // m) * m


def election_model_forward(x, params, *, tb=4096, use_bf16=True):
    """x: (B, F) float32. params: dict of w1,b1,w2,b2,w3,b3 with w as (in, out)."""
    B, F = x.shape
    compute_dtype = jnp.bfloat16 if use_bf16 else jnp.float32
    align = 16 if use_bf16 else 8  # bf16 packs two rows per sublane

    # ---- batch tiling: balanced tiles (bounded pad waste), >=2 tiles on big
    # batches so v7x can shard the parallel axis across both TensorCores. ----
    b_aligned = max(align, _round_up(B, align))
    tb_cap = max(align, min(_round_up(tb, align), b_aligned))
    n_tiles = pl.cdiv(b_aligned, tb_cap)
    if n_tiles == 1 and b_aligned >= 256:
        n_tiles = 2  # keep both v7x TensorCores busy; free on v5e/v6e
    tb_eff = _round_up(-(-b_aligned // n_tiles), align)
    bp = n_tiles * tb_eff  # padded batch (pad waste is at most ~n_tiles*align rows)

    x_p = x.astype(compute_dtype)
    if bp != B:
        x_p = jnp.pad(x_p, ((0, bp - B), (0, 0)))

    # ---- params: bf16 weights (f32 biases), hidden-64 padded to 128 ----
    w1 = params["w1"].astype(compute_dtype)                                   # (F, 128)
    b1 = params["b1"].astype(jnp.float32)                                     # (1, 128)
    w2 = jnp.pad(params["w2"], ((0, 0), (0, H2_PAD - H2))).astype(compute_dtype)  # (128, 128)
    b2 = jnp.pad(params["b2"], ((0, 0), (0, H2_PAD - H2))).astype(jnp.float32)    # (1, 128)
    w3 = jnp.pad(params["w3"], ((0, H2_PAD - H2), (0, 0))).astype(compute_dtype)  # (128, 2)
    b3 = params["b3"].astype(jnp.float32)                                     # (1, 2)

    grid = (n_tiles,)

    if n_tiles >= 3:
        # Deeper input buffering to hide the only per-step DMA that changes.
        x_spec = pl.BlockSpec((tb_eff, F), lambda i: (i, 0),
                              pipeline_mode=pl.Buffered(3))
    else:
        x_spec = pl.BlockSpec((tb_eff, F), lambda i: (i, 0))

    itemsize = jnp.dtype(compute_dtype).itemsize
    flops = 2 * bp * (F * H1 + H1 * H2_PAD + H2_PAD * OUT)
    bytes_accessed = (
        bp * F * itemsize                                   # x read
        + (F * H1 + H1 * H2_PAD + H2_PAD * OUT) * itemsize  # weights
        + (H1 + H2_PAD + OUT) * 4                           # biases
        + bp * OUT * 4                                      # narrow logit writeback
    )

    out = pl.pallas_call(
        mlp_kernel,
        out_shape=jax.ShapeDtypeStruct((bp, OUT), jnp.float32),
        grid_spec=pl.GridSpec(
            grid=grid,
            in_specs=[
                x_spec,                                          # x tile
                pl.BlockSpec((F, H1), lambda i: (0, 0)),         # w1 (resident)
                pl.BlockSpec((1, H1), lambda i: (0, 0)),         # b1
                pl.BlockSpec((H1, H2_PAD), lambda i: (0, 0)),    # w2 (padded)
                pl.BlockSpec((1, H2_PAD), lambda i: (0, 0)),     # b2 (padded)
                pl.BlockSpec((H2_PAD, OUT), lambda i: (0, 0)),   # w3 (padded K)
                pl.BlockSpec((1, OUT), lambda i: (0, 0)),        # b3
            ],
            out_specs=pl.BlockSpec((tb_eff, OUT), lambda i: (i, 0)),
        ),
        compiler_params=pltpu.CompilerParams(
            dimension_semantics=("parallel",)),
        cost_estimate=pl.CostEstimate(
            flops=flops, transcendentals=0, bytes_accessed=bytes_accessed),
    )(x_p, w1, b1, w2, b2, w3, b3)

    # Only batch padding is sliced away (cheap: the array is already 2 lanes wide).
    return out[:B]


def init_params(key, input_size):
    """Deterministic init mimicking PyTorch Linear default (uniform +-1/sqrt(fan_in))."""
    ks = jax.random.split(key, 6)

    def lin(kw, kb, fan_in, fan_out):
        bound = 1.0 / jnp.sqrt(fan_in)
        w = jax.random.uniform(kw, (fan_in, fan_out), jnp.float32, -bound, bound)
        b = jax.random.uniform(kb, (1, fan_out), jnp.float32, -bound, bound)
        return w, b

    w1, b1 = lin(ks[0], ks[1], input_size, H1)
    w2, b2 = lin(ks[2], ks[3], H1, H2)
    w3, b3 = lin(ks[4], ks[5], H2, OUT)
    return dict(w1=w1, b1=b1, w2=w2, b2=b2, w3=w3, b3=b3)


def reference_forward(x, p):
    h1 = jnp.maximum(x @ p["w1"] + p["b1"], 0.0)
    h2 = jnp.maximum(h1 @ p["w2"] + p["b2"], 0.0)
    return h2 @ p["w3"] + p["b3"]


if __name__ == "__main__":
    key = jax.random.PRNGKey(0)
    k_x, k_p, k_x2, k_x3 = jax.random.split(key, 4)

    batch, input_size = 8, 32
    x = jax.random.normal(k_x, (batch, input_size), jnp.float32)
    params = init_params(k_p, input_size)
    ref = reference_forward(x, params)

    # f32 path: should match the f32 reference tightly.
    out_f32 = jax.block_until_ready(
        election_model_forward(x, params, use_bf16=False))
    assert out_f32.shape == (batch, OUT)
    assert jnp.allclose(out_f32, ref, atol=1e-5, rtol=1e-5), "f32 mismatch vs reference"

    # Default bf16 MXU path: looser tolerance vs the f32 reference.
    out_bf16 = jax.block_until_ready(election_model_forward(x, params))
    assert out_bf16.shape == (batch, OUT)
    assert jnp.allclose(out_bf16, ref, atol=1e-1, rtol=1e-1), "bf16 mismatch vs reference"

    # Ragged batch (not a multiple of 16) exercises the padding path.
    batch2 = 13
    x2 = jax.random.normal(k_x2, (batch2, input_size), jnp.float32)
    out2 = jax.block_until_ready(election_model_forward(x2, params))
    ref2 = reference_forward(x2, params)
    assert out2.shape == (batch2, OUT)
    assert jnp.allclose(out2, ref2, atol=1e-1, rtol=1e-1), "mismatch vs reference (ragged)"

    # Moderate batch exercises the multi-tile grid (>=2 parallel steps for v7x).
    batch3 = 300
    x3 = jax.random.normal(k_x3, (batch3, input_size), jnp.float32)
    out3 = jax.block_until_ready(election_model_forward(x3, params))
    ref3 = reference_forward(x3, params)
    assert out3.shape == (batch3, OUT)
    assert jnp.allclose(out3, ref3, atol=1e-1, rtol=1e-1), "mismatch vs reference (multi-tile)"

    print("KERNEL_OK")
</pallas_src>

<mosaic_0001>
module attributes {stable_mosaic.version = 11 : i64} {
  func.func @mlp_kernel(%arg0: i32, %arg1: memref<8x32xf32, #tpu.memory_space<vmem>>, %arg2: memref<32x128xf32, #tpu.memory_space<vmem>>, %arg3: memref<1x128xf32, #tpu.memory_space<vmem>>, %arg4: memref<128x128xf32, #tpu.memory_space<vmem>>, %arg5: memref<1x128xf32, #tpu.memory_space<vmem>>, %arg6: memref<128x2xf32, #tpu.memory_space<vmem>>, %arg7: memref<1x2xf32, #tpu.memory_space<vmem>>, %arg8: memref<8x2xf32, #tpu.memory_space<vmem>>) attributes {dimension_semantics = [#tpu.dimension_semantics<parallel>], iteration_bounds = array<i64: 1>, scalar_prefetch = 0 : i64, scratch_operands = 0 : i64, tpu.core_type = #tpu.core_type<tc>, window_params = [{transform_indices = @transform_0, window_bounds = array<i64: 8, 32>}, {pipeline_mode = #tpu.pipeline_mode<synchronous>, transform_indices = @transform_1, window_bounds = array<i64: 32, 128>}, {pipeline_mode = #tpu.pipeline_mode<synchronous>, transform_indices = @transform_2, window_bounds = array<i64: 1, 128>}, {pipeline_mode = #tpu.pipeline_mode<synchronous>, transform_indices = @transform_3, window_bounds = array<i64: 128, 128>}, {pipeline_mode = #tpu.pipeline_mode<synchronous>, transform_indices = @transform_4, window_bounds = array<i64: 1, 128>}, {pipeline_mode = #tpu.pipeline_mode<synchronous>, transform_indices = @transform_5, window_bounds = array<i64: 128, 2>}, {pipeline_mode = #tpu.pipeline_mode<synchronous>, transform_indices = @transform_6, window_bounds = array<i64: 1, 2>}, {transform_indices = @transform_7, window_bounds = array<i64: 8, 2>}]} {
    %c0 = arith.constant 0 : index
    %c0_0 = arith.constant 0 : index
    %0 = vector.load %arg1[%c0, %c0_0] : memref<8x32xf32, #tpu.memory_space<vmem>>, vector<8x32xf32>
    %c0_1 = arith.constant 0 : index
    %c0_2 = arith.constant 0 : index
    %1 = vector.load %arg2[%c0_1, %c0_2] : memref<32x128xf32, #tpu.memory_space<vmem>>, vector<32x128xf32>
    %cst = arith.constant dense<0.000000e+00> : vector<8x128xf32>
    %2 = tpu.matmul %0, %1, %cst {dimension_numbers = #tpu.dot_dimension_numbers<[1], [0], [0], [1], [0, 0, 1, 1], [], []>} : vector<8x32xf32>, vector<32x128xf32>, vector<8x128xf32> -> vector<8x128xf32>
    %c0_3 = arith.constant 0 : index
    %c0_4 = arith.constant 0 : index
    %3 = vector.load %arg3[%c0_3, %c0_4] : memref<1x128xf32, #tpu.memory_space<vmem>>, vector<1x128xf32>
    %4 = vector.broadcast %3 : vector<1x128xf32> to vector<8x128xf32>
    %5 = arith.addf %2, %4 : vector<8x128xf32>
    %cst_5 = arith.constant 0.000000e+00 : f32
    %6 = vector.broadcast %cst_5 : f32 to vector<8x128xf32>
    %7 = arith.maximumf %5, %6 : vector<8x128xf32>
    %c0_6 = arith.constant 0 : index
    %c0_7 = arith.constant 0 : index
    %8 = vector.load %arg4[%c0_6, %c0_7] : memref<128x128xf32, #tpu.memory_space<vmem>>, vector<128x128xf32>
    %cst_8 = arith.constant dense<0.000000e+00> : vector<8x128xf32>
    %9 = tpu.matmul %7, %8, %cst_8 {dimension_numbers = #tpu.dot_dimension_numbers<[1], [0], [0], [1], [0, 0, 1, 1], [], []>} : vector<8x128xf32>, vector<128x128xf32>, vector<8x128xf32> -> vector<8x128xf32>
    %c0_9 = arith.constant 0 : index
    %c0_10 = arith.constant 0 : index
    %10 = vector.load %arg5[%c0_9, %c0_10] : memref<1x128xf32, #tpu.memory_space<vmem>>, vector<1x128xf32>
    %11 = vector.broadcast %10 : vector<1x128xf32> to vector<8x128xf32>
    %12 = arith.addf %9, %11 : vector<8x128xf32>
    %cst_11 = arith.constant 0.000000e+00 : f32
    %13 = vector.broadcast %cst_11 : f32 to vector<8x128xf32>
    %14 = arith.maximumf %12, %13 : vector<8x128xf32>
    %c0_12 = arith.constant 0 : index
    %c0_13 = arith.constant 0 : index
    %15 = vector.load %arg6[%c0_12, %c0_13] : memref<128x2xf32, #tpu.memory_space<vmem>>, vector<128x2xf32>
    %cst_14 = arith.constant dense<0.000000e+00> : vector<8x2xf32>
    %16 = tpu.matmul %14, %15, %cst_14 {dimension_numbers = #tpu.dot_dimension_numbers<[1], [0], [0], [1], [0, 0, 1, 1], [], []>} : vector<8x128xf32>, vector<128x2xf32>, vector<8x2xf32> -> vector<8x2xf32>
    %c0_15 = arith.constant 0 : index
    %c0_16 = arith.constant 0 : index
    %17 = vector.load %arg7[%c0_15, %c0_16] : memref<1x2xf32, #tpu.memory_space<vmem>>, vector<1x2xf32>
    %18 = vector.broadcast %17 : vector<1x2xf32> to vector<8x2xf32>
    %19 = arith.addf %16, %18 : vector<8x2xf32>
    %c0_17 = arith.constant 0 : index
    %c0_18 = arith.constant 0 : index
    %20 = vector.load %arg8[%c0_17, %c0_18] : memref<8x2xf32, #tpu.memory_space<vmem>>, vector<8x2xf32>
    tpu.vector_store %arg8[%c0_17, %c0_18], %19 {strides = array<i32>} : memref<8x2xf32, #tpu.memory_space<vmem>>, vector<8x2xf32>,
    return
  }
  func.func @transform_0(%arg0: i32) -> (i32, i32) {
    %c0_i32 = arith.constant 0 : i32
    %c0_i32_0 = arith.constant 0 : i32
    return %arg0, %c0_i32 : i32, i32
  }
  func.func @transform_1(%arg0: i32) -> (i32, i32) {
    %c0_i32 = arith.constant 0 : i32
    %c0_i32_0 = arith.constant 0 : i32
    %c0_i32_1 = arith.constant 0 : i32
    return %c0_i32, %c0_i32_0 : i32, i32
  }
  func.func @transform_2(%arg0: i32) -> (i32, i32) {
    %c0_i32 = arith.constant 0 : i32
    %c0_i32_0 = arith.constant 0 : i32
    %c0_i32_1 = arith.constant 0 : i32
    return %c0_i32, %c0_i32_0 : i32, i32
  }
  func.func @transform_3(%arg0: i32) -> (i32, i32) {
    %c0_i32 = arith.constant 0 : i32
    %c0_i32_0 = arith.constant 0 : i32
    %c0_i32_1 = arith.constant 0 : i32
    return %c0_i32, %c0_i32_0 : i32, i32
  }
  func.func @transform_4(%arg0: i32) -> (i32, i32) {
    %c0_i32 = arith.constant 0 : i32
    %c0_i32_0 = arith.constant 0 : i32
    %c0_i32_1 = arith.constant 0 : i32
    return %c0_i32, %c0_i32_0 : i32, i32
  }
  func.func @transform_5(%arg0: i32) -> (i32, i32) {
    %c0_i32 = arith.constant 0 : i32
    %c0_i32_0 = arith.constant 0 : i32
    %c0_i32_1 = arith.constant 0 : i32
    return %c0_i32, %c0_i32_0 : i32, i32
  }
  func.func @transform_6(%arg0: i32) -> (i32, i32) {
    %c0_i32 = arith.constant 0 : i32
    %c0_i32_0 = arith.constant 0 : i32
    %c0_i32_1 = arith.constant 0 : i32
    return %c0_i32, %c0_i32_0 : i32, i32
  }
  func.func @transform_7(%arg0: i32) -> (i32, i32) {
    %c0_i32 = arith.constant 0 : i32
    %c0_i32_0 = arith.constant 0 : i32
    return %arg0, %c0_i32 : i32, i32
  }
}

</mosaic_0001>

<bundles_post_ra>
// kernel: tpu_custom_call.1
= control target key start
LH: loop header
LB: loop body
LE: loop exit
PB: predicated region body
PF: predicated region fallthrough
CT: control target
= control target key end

     0   :  { %12 = vsyncpa [#allocation3], 0  ;;  %s397_s0 = inlined_call_operand.hbm [shape: f32[8,32], index: 0, kind: input, shape index: {}]   ;;  %s398_s1 = inlined_call_operand.hbm [shape: f32[32,128], index: 1, kind: input, shape index: {}]   ;;  %s399_s2 = inlined_call_operand.vmem [shape: f32[1,128], index: 2, kind: input, shape index: {}]   ;;  %s400_s3 = inlined_call_operand.vmem [shape: f32[128,128], index: 3, kind: input, shape index: {}]   ;;  %s401_s4 = inlined_call_operand.vmem [shape: f32[1,128], index: 4, kind: input, shape index: {}]   ;;  %s402_s5 = inlined_call_operand.vmem [shape: f32[128,2], index: 5, kind: input, shape index: {}]   ;;  %s403_s6 = inlined_call_operand.vmem [shape: f32[1,2], index: 6, kind: input, shape index: {}]   ;;  %s404_s7 = inlined_call_operand.vmem [shape: f32[8,2], index: 7, kind: output, shape index: {}]  }
   0x1   :  { %s19_s26 = sshll.u32 %s397_s0, 4  ;;  %s20_s26 = int_to_ptr.hbm [resolvable:$true] %s19_s26 }
   0x2   :  { %13 = vsyncpa [#allocation5], 0  ;;  %s239_s27 = smov [#allocation2]   ;;  %s29_s8 = sshll.u32 %s398_s1, 4  ;;  %s30_s8 = int_to_ptr.hbm [resolvable:$true] %s29_s8 }
   0x3   :  { %s21_s28 = sshll.u32 %s239_s27, 4  ;;  %s240_s9 = smov [#allocation4]   ;;  %s22_s28 = int_to_ptr.vmem [resolvable:$true] %s21_s28 }
   0x4   :  { %24 = dma.hbm_to_vmem [thread:$0]  %s20_s26, 128, %s22_s28, [#allocation3]  }
   0x5   :  { %s31_s10 = sshll.u32 %s240_s9, 4  ;;  %s241_s11 = smov 128   ;;  %s32_s10 = int_to_ptr.vmem [resolvable:$true] %s31_s10 }
   0x6   :  { %s242_s12 = smov 8  }
   0x7   :  { %37 = dma.hbm_to_vmem [thread:$0]  %s30_s8, 512, %s32_s10, [#allocation5], %s241_s11, %s241_s11, %s242_s12  }
   0x8   :  { %235 = dma.done.wait [#allocation3], 128  }
   0x9   :  { %236 = vsyncadd [#allocation3], 4294967168 }
   0xa   :  { %237 = dma.done.wait [#allocation5], 512  }
   0xb   :  { %238 = vsyncadd [#allocation5], 4294966784  ;;  %v60_v0 = vld [vmem:[#allocation4 + $0x18] sm:$0xff]  ;;  %v59_v1 = vld [vmem:[#allocation4 + $0x10] sm:$0xff]  ;;  %vm65_vm0 = vcmask 261120   ;;  %vm171_vm1 = vcmask 15360  }
   0xc   :  { %81 = vmatpush.msra.mxu0 %v60_v0  ;;  %v105_v2 = vld [vmem:[%s400_s3 + $0x78] sm:$0xff]  ;;  %v58_v3 = vld [vmem:[#allocation4 + $0x8] sm:$0xff]  ;;  %v103_v5 = vld [vmem:[%s400_s3 + $0x68] sm:$0xff] }
   0xd   :  { %110 = vmatpush.msra.mxu1 %v105_v2  ;;  %v104_v4 = vld [vmem:[%s400_s3 + $0x70] sm:$0xff]  ;;  %v57_v6 = vld [vmem:[#allocation4] sm:$0xff]  ;;  %v56_v7 = vld [vmem:[#allocation2] sm:$0xff] }
   0xe   :  { %82 = vmatpush.msra.mxu0 %v59_v1  ;;  %v102_v8 = vld [vmem:[%s400_s3 + $0x60] sm:$0xff]  ;;  %v101_v9 = vld [vmem:[%s400_s3 + $0x58] sm:$0xff]  ;;  %v100_v10 = vld [vmem:[%s400_s3 + $0x50] sm:$0xff] }
   0xf   :  { %111 = vmatpush.msra.mxu1 %v104_v4  ;;  %v99_v11 = vld [vmem:[%s400_s3 + $0x48] sm:$0xff]  ;;  %v98_v12 = vld [vmem:[%s400_s3 + $0x40] sm:$0xff]  ;;  %v97_v13 = vld [vmem:[%s400_s3 + $0x38] sm:$0xff] }
  0x10   :  { %83 = vmatpush.msra.mxu0 %v58_v3  ;;  %v96_v14 = vld [vmem:[%s400_s3 + $0x30] sm:$0xff]  ;;  %v95_v15 = vld [vmem:[%s400_s3 + $0x28] sm:$0xff]  ;;  %v94_v16 = vld [vmem:[%s400_s3 + $0x20] sm:$0xff] }
  0x11   :  { %112 = vmatpush.msra.mxu1 %v103_v5  ;;  %v93_v17 = vld [vmem:[%s400_s3 + $0x18] sm:$0xff]  ;;  %v92_v18 = vld [vmem:[%s400_s3 + $0x10] sm:$0xff]  ;;  %v91_v19 = vld [vmem:[%s400_s3 + $0x8] sm:$0xff] }
  0x12   :  { %84 = vmatpush.msra.mxu0 %v57_v6  ;;  %v90_v20 = vld [vmem:[%s400_s3] sm:$0xff]  ;;  %v146_v21 = vld [vmem:[%s402_s5 + $0x78] sm:$0xff]  ;;  %v145_v22 = vld [vmem:[%s402_s5 + $0x70] sm:$0xff] }
  0x13   :  { %179 = vmatmul.msk.f32.vlgmr.msra.gmra.mxu0 %vm65_vm0, %v56_v7  ;;  %113 = vmatpush.msra.mxu1 %v102_v8  ;;  %v144_v23 = vld [vmem:[%s402_s5 + $0x68] sm:$0xff]  ;;  %v143_v24 = vld [vmem:[%s402_s5 + $0x60] sm:$0xff]  ;;  %v142_v25 = vld [vmem:[%s402_s5 + $0x58] sm:$0xff] }
  0x14   :  { %151 = vmatpush.msra.mxu2 %v146_v21  ;;  %v141_v26 = vld [vmem:[%s402_s5 + $0x50] sm:$0xff]  ;;  %v140_v27 = vld [vmem:[%s402_s5 + $0x48] sm:$0xff]  ;;  %v139_v28 = vld [vmem:[%s402_s5 + $0x40] sm:$0xff] }
  0x15   :  { %114 = vmatpush.msra.mxu1 %v101_v9  ;;  %v138_v29 = vld [vmem:[%s402_s5 + $0x38] sm:$0xff]  ;;  %v137_v30 = vld [vmem:[%s402_s5 + $0x30] sm:$0xff]  ;;  %v136_v31 = vld [vmem:[%s402_s5 + $0x28] sm:$0xff] }
  0x16   :  { %152 = vmatpush.msra.mxu2 %v145_v22  ;;  %v135_v32 = vld [vmem:[%s402_s5 + $0x20] sm:$0xff]  ;;  %v134_v33 = vld [vmem:[%s402_s5 + $0x18] sm:$0xff]  ;;  %v133_v38 = vld [vmem:[%s402_s5 + $0x10] sm:$0xff] }
  0x17   :  { %115 = vmatpush.msra.mxu1 %v100_v10  ;;  %v184_v34 = vld [vmem:[%s399_s2] ss:$0 sm:$0xff]  ;;  %v132_v39 = vld [vmem:[%s402_s5 + $0x8] sm:$0xff] }
  0x18   :  { %153 = vmatpush.msra.mxu2 %v144_v23  ;;  %v131_v40 = vld [vmem:[%s402_s5] sm:$0xff] }
  0x19   :  { %116 = vmatpush.msra.mxu1 %v99_v11  ;;  %v185_v41 = vld [vmem:[%s401_s4] ss:$0 sm:$0xff] }
  0x1a   :  { %154 = vmatpush.msra.mxu2 %v143_v24  ;;  %v186_v45 = vld [vmem:[%s403_s6] ss:$0 sm:$0xff] }
  0x1b   :  { %117 = vmatpush.msra.mxu1 %v98_v12 }
  0x1c   :  { %155 = vmatpush.msra.mxu2 %v142_v25 }
  0x1d   :  { %118 = vmatpush.msra.mxu1 %v97_v13 }
  0x1e   :  { %156 = vmatpush.msra.mxu2 %v141_v26 }
  0x1f   :  { %119 = vmatpush.msra.mxu1 %v96_v14 }
  0x20   :  { %157 = vmatpush.msra.mxu2 %v140_v27 }
  0x21   :  { %120 = vmatpush.msra.mxu1 %v95_v15 }
  0x22   :  { %158 = vmatpush.msra.mxu2 %v139_v28 }
  0x23   :  { %121 = vmatpush.msra.mxu1 %v94_v16 }
  0x24   :  { %159 = vmatpush.msra.mxu2 %v138_v29 }
  0x25   :  { %122 = vmatpush.msra.mxu1 %v93_v17 }
  0x26   :  { %160 = vmatpush.msra.mxu2 %v137_v30 }
  0x27   :  { %123 = vmatpush.msra.mxu1 %v92_v18 }
  0x28   :  { %161 = vmatpush.msra.mxu2 %v136_v31 }
  0x29   :  { %124 = vmatpush.msra.mxu1 %v91_v19 }
  0x2a   :  { %162 = vmatpush.msra.mxu2 %v135_v32 }
  0x2b   :  { %125 = vmatpush.msra.mxu1 %v90_v20 }
  0x2c   :  { %163 = vmatpush.msra.mxu2 %v134_v33 }
  0x2e   :  { %164 = vmatpush.msra.mxu2 %v133_v38 }
  0x30   :  { %165 = vmatpush.msra.mxu2 %v132_v39 }
  0x32   :  { %166 = vmatpush.msra.mxu2 %v131_v40 }
  0x90   :  { %v86_v35 = vpop.f32.mrf.mxu0 }
  0x91   :  { %v87_v36 = vadd.f32 %v184_v34, %v86_v35 }
  0x93   :  { %v89_v37 = vmax.f32 %v87_v36, 0.0 }
  0x95   :  { %126 = vmatmul.f32.vlgmr.msra.gmra.mxu1 %v89_v37 }
 0x112   :  { %v127_v42 = vpop.f32.mrf.mxu1 }
 0x113   :  { %v128_v43 = vadd.f32 %v185_v41, %v127_v42 }
 0x115   :  { %v130_v44 = vmax.f32 %v128_v43, 0.0 }
 0x117   :  { %167 = vmatmul.f32.vlgmr.msra.gmra.mxu2 %v130_v44 }
 0x19a   :  { %v168_v46 = vpop.f32.mrf.mxu2 }
 0x19b   :  { %v169_v47 = vadd.f32 %v186_v45, %v168_v46 }
 0x19d   :  { %172 = vst.msk [vmem:[%s404_s7] sm:$0xff] %vm171_vm1, %v169_v47 }
 0x19e   :  { %177 = vsyncpa [#allocation3], 1 }
 0x19f   :  { %178 = vsyncpa [#allocation5], 1 }

</bundles_post_ra>
